<compile_context>
chip_gen: v7x
topology: tpu7x:2x2x1
jax: 0.10.0
libtpu: 0.0.40
codegen_flags: <defaults>
</compile_context>

<pallas_src>
from functools import partial

import jax
import jax.numpy as jnp
from jax.experimental import pallas as pl
from jax.experimental.pallas import tpu as pltpu


_TARGET_K = 256   # MXU contraction-depth target (v6e/v7x); ~128 is the sweet spot on v5e.


def _tap_group_size(channels):
    """Taps per MXU matmul so K = group*C ~ _TARGET_K; caps im2col amplification at group-x."""
    return max(1, min(9, _TARGET_K // max(channels, 1)))


def _conv3x3_grouped(x_bf16, w_ref, b_col, channels, tap_offsets, out_len, group):
    """3x3 'valid' conv + bias + ReLU on a channels-major, spatially-flattened activation.

    x_bf16: (C, Lsrc)    bf16 activation, spatial flattened with row stride W
    w_ref : (Cout, 9*C)  bf16 weight Ref, columns ordered (ky, kx, c)
    b_col : (Cout, 1)    f32 bias
    Returns (Cout, out_len) f32.  Columns whose flattened position wraps an image row are
    garbage but are never read downstream / never surfaced as valid output.
    """
    acc = None
    for g0 in range(0, 9, group):
        offs = tap_offsets[g0:g0 + group]
        if len(offs) == 1:
            patch = x_bf16[:, offs[0]:offs[0] + out_len]                       # (C, L)
        else:
            patch = jnp.concatenate(
                [x_bf16[:, o:o + out_len] for o in offs], axis=0)              # (g*C, L)
        w_g = w_ref[:, g0 * channels:(g0 + len(offs)) * channels]              # (Cout, g*C)
        part = jnp.dot(w_g, patch, preferred_element_type=jnp.float32)         # f32 accum
        acc = part if acc is None else acc + part
    return jnp.maximum(acc + b_col, 0.0)


def _double_conv_kernel(x_ref, w1_ref, b1_ref, w2_ref, b2_ref, o_ref, *,
                        height, width, cin, cout, group1, group2):
    """Fused DoubleConv for one batch element.

    x_ref : (1, Cin, H*W)        f32  (NCHW, spatial flattened)
    w1_ref: (Cout, 9*Cin)        bf16
    b1_ref: (Cout, 1)            f32
    w2_ref: (Cout, 9*Cout)       bf16
    b2_ref: (Cout, 1)            f32
    o_ref : (1, Cout, (H-4)*W)   f32  padded flat output (wrapped cols stripped in wrapper)
    """
    w = width
    l1 = (height - 2) * w - 2            # flat length of conv1 output (row stride = W)
    l2 = (height - 4) * w - 4            # flat length of conv2 output (row stride = W)
    offs = tuple(ky * w + kx for ky in range(3) for kx in range(3))

    # Cast the activation to bf16 ONCE, then build the lane-shifted taps from it.
    x_bf = x_ref[0].astype(jnp.bfloat16)                                   # (Cin, H*W)

    # conv1 + bias + ReLU; the intermediate never leaves the chip.
    y1 = _conv3x3_grouped(x_bf, w1_ref, b1_ref[...], cin, offs, l1, group1)
    y1_bf = y1.astype(jnp.bfloat16)                                        # (Cout, l1)

    # conv2 + bias + ReLU (wrapped columns of y1 are never read: valid conv2 columns only
    # touch y1 columns 0..W-3 of each row).
    y2 = _conv3x3_grouped(y1_bf, w2_ref, b2_ref[...], cout, offs, l2, group2)

    # ONE contiguous lane-dense store; the trailing 4 lanes of the padded block stay
    # garbage and are stripped (never read) by the wrapper.
    o_ref[0, :, :l2] = y2.astype(o_ref.dtype)


@jax.jit
def double_conv(x_nchw, params):
    """DoubleConv forward. x_nchw: (N, Cin, H, W) f32 -> (N, Cout, H-4, W-4) f32."""
    w1, b1, w2, b2 = params
    n, cin, h, w = x_nchw.shape
    cout = w1.shape[-1]
    ho2, wo2 = h - 4, w - 4

    # Weights as (Cout, 9*C) matmul LHS in bf16 (MXU-native); biases as (Cout, 1) f32.
    w1m = w1.reshape(9 * cin, cout).T.astype(jnp.bfloat16)
    w2m = w2.reshape(9 * cout, cout).T.astype(jnp.bfloat16)
    b1m = b1.reshape(cout, 1).astype(jnp.float32)
    b2m = b2.reshape(cout, 1).astype(jnp.float32)

    # Trailing-dims reshape only (no transpose, no extra HBM pass): NCHW -> (N, C, H*W).
    x_flat = x_nchw.reshape(n, cin, h * w)

    group1 = _tap_group_size(cin)
    group2 = _tap_group_size(cout)

    kernel = partial(_double_conv_kernel, height=h, width=w, cin=cin, cout=cout,
                     group1=group1, group2=group2)
    out_flat = pl.pallas_call(
        kernel,
        out_shape=jax.ShapeDtypeStruct((n, cout, ho2 * w), x_nchw.dtype),
        grid=(n,),
        in_specs=[
            pl.BlockSpec((1, cin, h * w), lambda b: (b, 0, 0)),
            pl.BlockSpec((cout, 9 * cin), lambda b: (0, 0)),
            pl.BlockSpec((cout, 1), lambda b: (0, 0)),
            pl.BlockSpec((cout, 9 * cout), lambda b: (0, 0)),
            pl.BlockSpec((cout, 1), lambda b: (0, 0)),
        ],
        out_specs=pl.BlockSpec((1, cout, ho2 * w), lambda b: (b, 0, 0)),
        compiler_params=pltpu.CompilerParams(
            dimension_semantics=("parallel",),        # lets v7x shard batch over 2 TCs
            vmem_limit_bytes=48 * 1024 * 1024,        # <= 48 MiB: safe cap on v7x's 64 MiB
        ),
    )(x_flat, w1m, b1m, w2m, b2m)

    # Strip the 4 wrapped columns per row in the wrapper (free reshape + cheap slice),
    # instead of per-row masked stores inside the kernel.
    return out_flat.reshape(n, cout, ho2, w)[:, :, :, :wo2]


def init_double_conv_params(key, in_channels, out_channels):
    """Deterministic params; weights stored HWIO (3, 3, Cin, Cout), f32."""
    k1, k2, k3, k4 = jax.random.split(key, 4)
    fan1 = in_channels * 9
    fan2 = out_channels * 9
    bound1 = 1.0 / jnp.sqrt(fan1)
    bound2 = 1.0 / jnp.sqrt(fan2)
    w1 = jax.random.uniform(k1, (3, 3, in_channels, out_channels), jnp.float32, -bound1, bound1)
    b1 = jax.random.uniform(k2, (out_channels,), jnp.float32, -bound1, bound1)
    w2 = jax.random.uniform(k3, (3, 3, out_channels, out_channels), jnp.float32, -bound2, bound2)
    b2 = jax.random.uniform(k4, (out_channels,), jnp.float32, -bound2, bound2)
    return (w1, b1, w2, b2)


def _reference_double_conv(x_nchw, params):
    """Pure-JAX reference with numerics matched to the kernel (bf16 MXU inputs, f32 acc)."""
    w1, b1, w2, b2 = params
    dn = ("NCHW", "HWIO", "NCHW")
    y = jax.lax.conv_general_dilated(
        x_nchw.astype(jnp.bfloat16), w1.astype(jnp.bfloat16), (1, 1), "VALID",
        dimension_numbers=dn, preferred_element_type=jnp.float32)
    y = jnp.maximum(y + b1[None, :, None, None], 0.0)
    y = jax.lax.conv_general_dilated(
        y.astype(jnp.bfloat16), w2.astype(jnp.bfloat16), (1, 1), "VALID",
        dimension_numbers=dn, preferred_element_type=jnp.float32)
    y = jnp.maximum(y + b2[None, :, None, None], 0.0)
    return y


if __name__ == "__main__":
    key = jax.random.PRNGKey(0)
    kx, kp = jax.random.split(key)

    N, C_IN, H, W = 2, 4, 16, 16
    C_OUT = 8

    x = jax.random.normal(kx, (N, C_IN, H, W), dtype=jnp.float32)
    params = init_double_conv_params(kp, C_IN, C_OUT)

    out = jax.block_until_ready(double_conv(x, params))

    ref = _reference_double_conv(x, params)
    assert out.shape == (N, C_OUT, H - 4, W - 4), out.shape
    assert jnp.allclose(out, ref, atol=1e-2, rtol=1e-2), "mismatch vs reference"

    print("KERNEL_OK")
</pallas_src>

<mosaic_0001>
module attributes {stable_mosaic.version = 11 : i64} {
  func.func @_double_conv_kernel(%arg0: i32, %arg1: memref<1x4x256xf32, #tpu.memory_space<vmem>>, %arg2: memref<8x36xbf16, #tpu.memory_space<vmem>>, %arg3: memref<8x1xf32, #tpu.memory_space<vmem>>, %arg4: memref<8x72xbf16, #tpu.memory_space<vmem>>, %arg5: memref<8x1xf32, #tpu.memory_space<vmem>>, %arg6: memref<1x8x192xf32, #tpu.memory_space<vmem>>) attributes {dimension_semantics = [#tpu.dimension_semantics<parallel>], iteration_bounds = array<i64: 2>, scalar_prefetch = 0 : i64, scratch_operands = 0 : i64, tpu.core_type = #tpu.core_type<tc>, window_params = [{transform_indices = @transform_0, window_bounds = array<i64: 1, 4, 256>}, {pipeline_mode = #tpu.pipeline_mode<synchronous>, transform_indices = @transform_1, window_bounds = array<i64: 8, 36>}, {pipeline_mode = #tpu.pipeline_mode<synchronous>, transform_indices = @transform_2, window_bounds = array<i64: 8, 1>}, {pipeline_mode = #tpu.pipeline_mode<synchronous>, transform_indices = @transform_3, window_bounds = array<i64: 8, 72>}, {pipeline_mode = #tpu.pipeline_mode<synchronous>, transform_indices = @transform_4, window_bounds = array<i64: 8, 1>}, {transform_indices = @transform_5, window_bounds = array<i64: 1, 8, 192>}]} {
    %c0 = arith.constant 0 : index
    %c0_0 = arith.constant 0 : index
    %c0_1 = arith.constant 0 : index
    %0 = vector.load %arg1[%c0, %c0_0, %c0_1] : memref<1x4x256xf32, #tpu.memory_space<vmem>>, vector<1x4x256xf32>
    %1 = vector.shape_cast %0 : vector<1x4x256xf32> to vector<4x256xf32>
    %2 = arith.truncf %1 : vector<4x256xf32> to vector<4x256xbf16>
    %c0_2 = arith.constant 0 : index
    %c0_3 = arith.constant 0 : index
    %3 = vector.load %arg3[%c0_2, %c0_3] : memref<8x1xf32, #tpu.memory_space<vmem>>, vector<8x1xf32>
    %4 = vector.extract_strided_slice %2 {offsets = [0, 0], sizes = [4, 222], strides = [1, 1]} : vector<4x256xbf16> to vector<4x222xbf16>
    %5 = vector.extract_strided_slice %2 {offsets = [0, 1], sizes = [4, 222], strides = [1, 1]} : vector<4x256xbf16> to vector<4x222xbf16>
    %6 = vector.extract_strided_slice %2 {offsets = [0, 2], sizes = [4, 222], strides = [1, 1]} : vector<4x256xbf16> to vector<4x222xbf16>
    %7 = vector.extract_strided_slice %2 {offsets = [0, 16], sizes = [4, 222], strides = [1, 1]} : vector<4x256xbf16> to vector<4x222xbf16>
    %8 = vector.extract_strided_slice %2 {offsets = [0, 17], sizes = [4, 222], strides = [1, 1]} : vector<4x256xbf16> to vector<4x222xbf16>
    %9 = vector.extract_strided_slice %2 {offsets = [0, 18], sizes = [4, 222], strides = [1, 1]} : vector<4x256xbf16> to vector<4x222xbf16>
    %10 = vector.extract_strided_slice %2 {offsets = [0, 32], sizes = [4, 222], strides = [1, 1]} : vector<4x256xbf16> to vector<4x222xbf16>
    %11 = vector.extract_strided_slice %2 {offsets = [0, 33], sizes = [4, 222], strides = [1, 1]} : vector<4x256xbf16> to vector<4x222xbf16>
    %12 = vector.extract_strided_slice %2 {offsets = [0, 34], sizes = [4, 222], strides = [1, 1]} : vector<4x256xbf16> to vector<4x222xbf16>
    %13 = tpu.concatenate %4, %5, %6, %7, %8, %9, %10, %11, %12 in 0 : vector<4x222xbf16>, vector<4x222xbf16>, vector<4x222xbf16>, vector<4x222xbf16>, vector<4x222xbf16>, vector<4x222xbf16>, vector<4x222xbf16>, vector<4x222xbf16>, vector<4x222xbf16> -> vector<36x222xbf16>
    %c0_4 = arith.constant 0 : index
    %c0_5 = arith.constant 0 : index
    %14 = vector.load %arg2[%c0_4, %c0_5] : memref<8x36xbf16, #tpu.memory_space<vmem>>, vector<8x36xbf16>
    %cst = arith.constant dense<0.000000e+00> : vector<8x222xf32>
    %15 = tpu.matmul %14, %13, %cst {dimension_numbers = #tpu.dot_dimension_numbers<[1], [0], [0], [1], [0, 0, 1, 1], [], []>} : vector<8x36xbf16>, vector<36x222xbf16>, vector<8x222xf32> -> vector<8x222xf32>
    %16 = vector.broadcast %3 : vector<8x1xf32> to vector<8x222xf32>
    %17 = arith.addf %15, %16 : vector<8x222xf32>
    %cst_6 = arith.constant 0.000000e+00 : f32
    %18 = vector.broadcast %cst_6 : f32 to vector<8x222xf32>
    %19 = arith.maximumf %17, %18 : vector<8x222xf32>
    %20 = arith.truncf %19 : vector<8x222xf32> to vector<8x222xbf16>
    %c0_7 = arith.constant 0 : index
    %c0_8 = arith.constant 0 : index
    %21 = vector.load %arg5[%c0_7, %c0_8] : memref<8x1xf32, #tpu.memory_space<vmem>>, vector<8x1xf32>
    %22 = vector.extract_strided_slice %20 {offsets = [0, 0], sizes = [8, 188], strides = [1, 1]} : vector<8x222xbf16> to vector<8x188xbf16>
    %23 = vector.extract_strided_slice %20 {offsets = [0, 1], sizes = [8, 188], strides = [1, 1]} : vector<8x222xbf16> to vector<8x188xbf16>
    %24 = vector.extract_strided_slice %20 {offsets = [0, 2], sizes = [8, 188], strides = [1, 1]} : vector<8x222xbf16> to vector<8x188xbf16>
    %25 = vector.extract_strided_slice %20 {offsets = [0, 16], sizes = [8, 188], strides = [1, 1]} : vector<8x222xbf16> to vector<8x188xbf16>
    %26 = vector.extract_strided_slice %20 {offsets = [0, 17], sizes = [8, 188], strides = [1, 1]} : vector<8x222xbf16> to vector<8x188xbf16>
    %27 = vector.extract_strided_slice %20 {offsets = [0, 18], sizes = [8, 188], strides = [1, 1]} : vector<8x222xbf16> to vector<8x188xbf16>
    %28 = vector.extract_strided_slice %20 {offsets = [0, 32], sizes = [8, 188], strides = [1, 1]} : vector<8x222xbf16> to vector<8x188xbf16>
    %29 = vector.extract_strided_slice %20 {offsets = [0, 33], sizes = [8, 188], strides = [1, 1]} : vector<8x222xbf16> to vector<8x188xbf16>
    %30 = vector.extract_strided_slice %20 {offsets = [0, 34], sizes = [8, 188], strides = [1, 1]} : vector<8x222xbf16> to vector<8x188xbf16>
    %31 = tpu.concatenate %22, %23, %24, %25, %26, %27, %28, %29, %30 in 0 : vector<8x188xbf16>, vector<8x188xbf16>, vector<8x188xbf16>, vector<8x188xbf16>, vector<8x188xbf16>, vector<8x188xbf16>, vector<8x188xbf16>, vector<8x188xbf16>, vector<8x188xbf16> -> vector<72x188xbf16>
    %c0_9 = arith.constant 0 : index
    %c0_10 = arith.constant 0 : index
    %32 = vector.load %arg4[%c0_9, %c0_10] : memref<8x72xbf16, #tpu.memory_space<vmem>>, vector<8x72xbf16>
    %cst_11 = arith.constant dense<0.000000e+00> : vector<8x188xf32>
    %33 = tpu.matmul %32, %31, %cst_11 {dimension_numbers = #tpu.dot_dimension_numbers<[1], [0], [0], [1], [0, 0, 1, 1], [], []>} : vector<8x72xbf16>, vector<72x188xbf16>, vector<8x188xf32> -> vector<8x188xf32>
    %34 = vector.broadcast %21 : vector<8x1xf32> to vector<8x188xf32>
    %35 = arith.addf %33, %34 : vector<8x188xf32>
    %cst_12 = arith.constant 0.000000e+00 : f32
    %36 = vector.broadcast %cst_12 : f32 to vector<8x188xf32>
    %37 = arith.maximumf %35, %36 : vector<8x188xf32>
    %c0_13 = arith.constant 0 : index
    %c0_14 = arith.constant 0 : index
    %c0_15 = arith.constant 0 : index
    %38 = vector.load %arg6[%c0_13, %c0_14, %c0_15] : memref<1x8x192xf32, #tpu.memory_space<vmem>>, vector<1x8x188xf32>
    %39 = vector.shape_cast %38 : vector<1x8x188xf32> to vector<8x188xf32>
    %40 = vector.shape_cast %37 : vector<8x188xf32> to vector<1x8x188xf32>
    tpu.vector_store %arg6[%c0_13, %c0_14, %c0_15], %40 {strides = array<i32>} : memref<1x8x192xf32, #tpu.memory_space<vmem>>, vector<1x8x188xf32>,
    return
  }
  func.func @transform_0(%arg0: i32) -> (i32, i32, i32) {
    %c0_i32 = arith.constant 0 : i32
    %c0_i32_0 = arith.constant 0 : i32
    %c0_i32_1 = arith.constant 0 : i32
    return %arg0, %c0_i32, %c0_i32_0 : i32, i32, i32
  }
  func.func @transform_1(%arg0: i32) -> (i32, i32) {
    %c0_i32 = arith.constant 0 : i32
    %c0_i32_0 = arith.constant 0 : i32
    %c0_i32_1 = arith.constant 0 : i32
    return %c0_i32, %c0_i32_0 : i32, i32
  }
  func.func @transform_2(%arg0: i32) -> (i32, i32) {
    %c0_i32 = arith.constant 0 : i32
    %c0_i32_0 = arith.constant 0 : i32
    %c0_i32_1 = arith.constant 0 : i32
    return %c0_i32, %c0_i32_0 : i32, i32
  }
  func.func @transform_3(%arg0: i32) -> (i32, i32) {
    %c0_i32 = arith.constant 0 : i32
    %c0_i32_0 = arith.constant 0 : i32
    %c0_i32_1 = arith.constant 0 : i32
    return %c0_i32, %c0_i32_0 : i32, i32
  }
  func.func @transform_4(%arg0: i32) -> (i32, i32) {
    %c0_i32 = arith.constant 0 : i32
    %c0_i32_0 = arith.constant 0 : i32
    %c0_i32_1 = arith.constant 0 : i32
    return %c0_i32, %c0_i32_0 : i32, i32
  }
  func.func @transform_5(%arg0: i32) -> (i32, i32, i32) {
    %c0_i32 = arith.constant 0 : i32
    %c0_i32_0 = arith.constant 0 : i32
    %c0_i32_1 = arith.constant 0 : i32
    return %arg0, %c0_i32, %c0_i32_0 : i32, i32, i32
  }
}

</mosaic_0001>

<bundles_post_ra>
// kernel: double_conv.1
= control target key start
LH: loop header
LB: loop body
LE: loop exit
PB: predicated region body
PF: predicated region fallthrough
CT: control target
= control target key end

     0   :  { %s662_s18 = smov 0   ;;  %s767_s0 = inlined_call_operand.vmem [shape: f32[2,4,256], index: 0, kind: input, shape index: {}]   ;;  %s768_s1 = inlined_call_operand.vmem [shape: bf16[8,36], index: 1, kind: input, shape index: {}]   ;;  %s769_s2 = inlined_call_operand.vmem [shape: f32[8,1], index: 2, kind: input, shape index: {}]   ;;  %s770_s3 = inlined_call_operand.vmem [shape: bf16[8,72], index: 3, kind: input, shape index: {}]   ;;  %s771_s4 = inlined_call_operand.vmem [shape: f32[8,1], index: 4, kind: input, shape index: {}]   ;;  %s772_s5 = inlined_call_operand.vmem [shape: f32[2,8,192], index: 5, kind: output, shape index: {}]  }
   0x1 LB: > { %s579_s19 = sadd.s32 4294967295, %s621_s18   ;;  %p583_p0 = scmp.ge.s32.totalorder %s621_s18, 1  ;;  %s621_s18 = sphi %s662_s18, %s15_s18  }
   0x2   : > { %p187_p1 = scmp.lt.s32.totalorder %s621_s18, 3 }
   0x4   : > { %p188_p2 = pnand %p583_p0, %p187_p1 }
   0x5   : > { %p215_p3 = scmp.lt.s32.totalorder (!%p188_p2), %s579_s19, 1  ;;  %s623_s24 = smov (!%p188_p2), 111   ;;  %v629_v10 = vmov (!%p188_p2), 0   ;;  %v232_v11 = vld [vmem:[%s769_s2] sm:$0xff] (!%p188_p2)  ;;  %vm241_vm0 = vcmask (!%p188_p2), 1039360   ;;  %vm289_vm1 = vcmask (!%p188_p2), 1041408  }
   0x6   : > { %191 = sbr.rel (%p188_p2) target bundleno = 758 (0x2f6), region = 40  ;;  %s624_s25 = smov (!%p188_p2), 126   ;;  %372 = vmatprep.mubr.bf16.mxu0 (!%p188_p2), %v629_v10  ;;  %613 = vset.pattern.permute.xlu0 (!%p188_p2), %v629_v10  ;;  %vm249_vm2 = vcmask (!%p188_p2), 1031168   ;;  %vm296_vm3 = vcmask (!%p188_p2), 1043456   ;;  %vm257_vm4 = vcmask (!%p188_p2), 916480   ;;  %vm301_vm5 = vcmask (!%p188_p2), 1045504  }
   0x7   : > { %s625_s26 = smov (!%p188_p2), 127   ;;  %s626_s27 = smov (!%p188_p2), 112   ;;  %510 = vmatprep.mubr.bf16.mxu1 (!%p188_p2), %v629_v10  ;;  %vm269_vm6 = vcmask (!%p188_p2), 900096   ;;  %vm275_vm7 = vcmask (!%p188_p2), 785408   ;;  %vm263_vm8 = vcmask (!%p188_p2), 908288   ;;  %vm281_vm9 = vcmask (!%p188_p2), 777216  }
   0x8   : > { %s627_s28 = smov (!%p188_p2), 110   ;;  %s628_s29 = smov (!%p188_p2), 96   ;;  %vm287_vm10 = vcmask (!%p188_p2), 769024   ;;  %v324_v49 = vld [vmem:[%s768_s1] sm:$0xf] (!%p188_p2)  ;;  %vm330_vm11 = vcmask (!%p188_p2), 293888  }
   0x9   : > { %s630_s30 = smov (!%p188_p2), 95   ;;  %s631_s6 = smov (!%p188_p2), 94   ;;  %v385_v63 = vld [vmem:[%s771_s4] sm:$0xff] (!%p188_p2)  ;;  %vm468_vm12 = vcmask (!%p188_p2), 588800   ;;  %vm522_vm13 = vcmask (!%p188_p2), 490496  }
   0xd   : > { %s774_s19 = smov (!%p215_p3, %s579_s19), 1 }
   0xe   : > { %s594_s20 = sshll.u32 %s774_s19, 3  ;;  %s595_s15 = sshll.u32 %s774_s19, 4 }
   0xf   : > { %s219_s23 = scalar_lea.vmem %s767_s0, %s594_s20  ;;  %s224_s20 = scalar_lea.vmem %s772_s5, %s595_s15 }
  0x10   : > { %v226_v0 = vld [vmem:[%s219_s23] sm:$0xff] }
  0x11   : > { %v230_v1 = vpack.c.bf16 %v226_v0, %v226_v0  ;;  %v228_v2 = vcombine.high %v226_v0, %v226_v0 }
  0x13   : > { %259 = vrot.lane.b32.xlu0 %v230_v1, %s623_s24  ;;  %v243_v3 = vrot.slane %v230_v1, 4  ;;  %v235_v4 = vrot.slane %v230_v1, 6  ;;  %v231_v5 = vpack.c.bf16 %v228_v2, %v228_v2  ;;  %v251_v6 = vrot.slane %v230_v1, 2 }
  0x15   : > { %245 = vrot.lane.b32.xlu1 %v243_v3, %s624_s25  ;;  %v244_v7 = vrot.slane %v231_v5, 4  ;;  %v236_v8 = vrot.slane %v231_v5, 6  ;;  %v252_v9 = vrot.slane %v231_v5, 2 }
  0x17   : > { %237 = vrot.lane.b32.xlu0 %v235_v4, %s625_s26 }
  0x19   : > { %261 = vrot.lane.b32.xlu1 %v231_v5, %s623_s24 }
  0x1b   : > { %253 = vrot.lane.b32.xlu0 %v251_v6, %s626_s27 }
  0x1d   : > { %247 = vrot.lane.b32.xlu1 %v244_v7, %s624_s25 }
  0x1f   : > { %239 = vrot.lane.b32.xlu0 %v236_v8, %s625_s26 }
  0x21   : > { %255 = vrot.lane.b32.xlu1 %v252_v9, %s626_s27 }
  0x23   : > { %265 = vrot.lane.b32.xlu0 %v235_v4, %s627_s28 }
  0x25   : > { %267 = vrot.lane.b32.xlu1 %v236_v8, %s627_s28 }
  0x27   : > { %271 = vrot.lane.b32.xlu0 %v243_v3, %s628_s29 }
  0x29   : > { %273 = vrot.lane.b32.xlu1 %v244_v7, %s628_s29 }
  0x2b   : > { %277 = vrot.lane.b32.xlu0 %v251_v6, %s630_s30 }
  0x2d   : > { %279 = vrot.lane.b32.xlu1 %v252_v9, %s630_s30 }
  0x2f   : > { %283 = vrot.lane.b32.xlu0 %v230_v1, %s631_s6 }
  0x31   : > { %285 = vrot.lane.b32.xlu1 %v231_v5, %s631_s6 }
  0x33   : > { %327 = vperm.xlu0 %613, %v232_v11  }
  0x85   : > { %v260_v12 = vpop.permute.xlu0 %259 }
  0x87   : > { %v246_v13 = vpop.permute.xlu1 %245 }
  0x89   : > { %v238_v14 = vpop.permute.xlu0 %237 }
  0x8b   : > { %v262_v15 = vpop.permute.xlu1 %261 }
  0x8c   : > { %v264_v36 = vsel %vm263_vm8, %v260_v12, %v262_v15 }
  0x8d   : > { %v254_v16 = vpop.permute.xlu0 %253 }
  0x8f   : > { %v248_v17 = vpop.permute.xlu1 %247 }
  0x90   : > { %v250_v21 = vsel %vm249_vm2, %v246_v13, %v248_v17 }
  0x91   : > { %v240_v18 = vpop.permute.xlu0 %239 }
  0x92   : > { %v242_v19 = vsel %vm241_vm0, %v238_v14, %v240_v18  ;;  %v295_v20 = vsel %vm289_vm1, %v231_v5, %v240_v18 }
  0x93   : > { %v292_v22 = vsel %vm289_vm1, %v230_v1, %v242_v19  ;;  %v256_v23 = vpop.permute.xlu1 %255  ;;  %v300_v24 = vsel %vm296_vm3, %v295_v20, %v248_v17 }
  0x94   : > { %v258_v25 = vsel %vm257_vm4, %v254_v16, %v256_v23  ;;  %v306_v26 = vsel %vm301_vm5, %v300_v24, %v256_v23  ;;  %v298_v27 = vsel %vm296_vm3, %v292_v22, %v250_v21 }
  0x95   : > { %340 = vmatprep.subr.bf16.mxu0 %v306_v26  ;;  %v303_v28 = vsel %vm301_vm5, %v298_v27, %v258_v25  ;;  %v266_v29 = vpop.permute.xlu0 %265 }
  0x96   : > { %341 = vmatpush1.bf16.msra.mxu0 %v303_v28 }
  0x97   : > { %v268_v30 = vpop.permute.xlu1 %267 }
  0x98   : > { %v270_v33 = vsel %vm269_vm6, %v266_v29, %v268_v30  ;;  %v313_v37 = vsel %vm289_vm1, %v262_v15, %v268_v30 }
  0x99   : > { %v272_v31 = vpop.permute.xlu0 %271  ;;  %v310_v38 = vsel %vm289_vm1, %v264_v36, %v270_v33  ;;  %v462_v33 = vld [vmem:[%s770_s3] sm:$0xf] }
  0x9b   : > { %v274_v32 = vpop.permute.xlu1 %273 }
  0x9c   : > { %v276_v34 = vsel %vm275_vm7, %v272_v31, %v274_v32  ;;  %v317_v39 = vsel %vm296_vm3, %v313_v37, %v274_v32 }
  0x9d   : > { %v278_v35 = vpop.permute.xlu0 %277  ;;  %v315_v43 = vsel %vm296_vm3, %v310_v38, %v276_v34 }
  0x9f   : > { %v280_v40 = vpop.permute.xlu1 %279 }
  0xa0   : > { %v282_v41 = vsel %vm281_vm9, %v278_v35, %v280_v40  ;;  %v322_v42 = vsel %vm301_vm5, %v317_v39, %v280_v40 }
  0xa1   : > { %342 = vmatprep.subr.bf16.mxu0 %v322_v42  ;;  %v319_v44 = vsel %vm301_vm5, %v315_v43, %v282_v41  ;;  %v284_v45 = vpop.permute.xlu0 %283 }
  0xa2   : > { %343 = vmatpush1.bf16.msra.mxu0 %v319_v44 }
  0xa3   : > { %v286_v46 = vpop.permute.xlu1 %285 }
  0xa4   : > { %v288_v47 = vsel %vm287_vm10, %v284_v45, %v286_v46  ;;  %588 = vmatprep.subr.msk.bf16.mxu0 %vm289_vm1, %v286_v46 }
  0xa5   : > { %v335_v48 = vsel %vm289_vm1, %v288_v47, 0 }
  0xa6   : > { %345 = vmatpush1.bf16.msra.mxu0 %v335_v48 }
  0xa9   : > { %589 = vmatmul.mubr.msk.bf16.vlgmr.msra.gmra.mrb[0].mxu0 %vm330_vm11, %v324_v49 }
  0xb2   : > { %v328_v50 = vpop.permute.xlu0 %327 }
 0x17c   : > { %v374_v51 = vpop.f32.mrb[0].mxu0 }
 0x17d   : > { %v375_v52 = vadd.f32 %v374_v51, %v328_v50  ;;  %v376_v53 = vpop.f32.mrb[1].mxu0 }
 0x17e   : > { %v377_v54 = vadd.f32 %v376_v53, %v328_v50  ;;  %v378_v55 = vpop.f32.mrb[2].mxu0 }
 0x17f   : > { %v381_v56 = vmax.f32 %v375_v52, 0.0  ;;  %v379_v57 = vpop.f32.mrb[3].mxu0 }
 0x180   : > { %v382_v58 = vmax.f32 %v377_v54, 0.0 }
 0x181   : > { %v383_v59 = vpack.c.bf16 %v381_v56, %v381_v56 }
 0x182   : > { %v384_v60 = vpack.c.bf16 %v382_v58, %v382_v58 }
 0x183   : > { %395 = vrot.lane.b32.xlu0 %v383_v59, %s624_s25  ;;  %v388_v61 = vrot.slane %v383_v59, 4 }
 0x184   : > { %397 = vrot.lane.b32.xlu1 %v384_v60, %s624_s25  ;;  %v389_v62 = vrot.slane %v384_v60, 4 }
 0x187   : > { %405 = vrot.lane.b32.xlu0 %v383_v59, %s623_s24 }
 0x188   : > { %407 = vrot.lane.b32.xlu1 %v384_v60, %s623_s24 }
 0x18b   : > { %415 = vrot.lane.b32.xlu0 %v383_v59, %s628_s29 }
 0x18c   : > { %417 = vrot.lane.b32.xlu1 %v384_v60, %s628_s29 }
 0x18f   : > { %400 = vrot.lane.b32.xlu0 %v388_v61, %s626_s27 }
 0x190   : > { %390 = vrot.lane.b32.xlu1 %v388_v61, %s625_s26 }
 0x193   : > { %410 = vrot.lane.b32.xlu0 %v388_v61, %s627_s28 }
 0x194   : > { %392 = vrot.lane.b32.xlu1 %v389_v62, %s625_s26 }
 0x197   : > { %420 = vrot.lane.b32.xlu0 %v388_v61, %s630_s30 }
 0x198   : > { %402 = vrot.lane.b32.xlu1 %v389_v62, %s626_s27 }
 0x19b   : > { %425 = vrot.lane.b32.xlu0 %v383_v59, %s631_s6 }
 0x19c   : > { %412 = vrot.lane.b32.xlu1 %v389_v62, %s627_s28 }
 0x19f   : > { %465 = vperm.xlu0 %613, %v385_v63  }
 0x1a0   : > { %422 = vrot.lane.b32.xlu1 %v389_v62, %s630_s30 }
 0x1a4   : > { %427 = vrot.lane.b32.xlu1 %v384_v60, %s631_s6 }
 0x1f5   : > { %v396_v0 = vpop.permute.xlu0 %395 }
 0x1f6   : > { %v398_v1 = vpop.permute.xlu1 %397 }
 0x1f7   : > { %v399_v14 = vsel %vm249_vm2, %v396_v0, %v398_v1 }
 0x1f9   : > { %v406_v2 = vpop.permute.xlu0 %405 }
 0x1fa   : > { %v408_v3 = vpop.permute.xlu1 %407 }
 0x1fb   : > { %v409_v19 = vsel %vm263_vm8, %v406_v2, %v408_v3 }
 0x1fd   : > { %v416_v4 = vpop.permute.xlu0 %415 }
 0x1fe   : > { %v418_v5 = vpop.permute.xlu1 %417 }
 0x1ff   : > { %v419_v25 = vsel %vm275_vm7, %v416_v4, %v418_v5 }
 0x201   : > { %v401_v7 = vpop.permute.xlu0 %400 }
 0x202   : > { %v391_v6 = vpop.permute.xlu1 %390 }
 0x205   : > { %v411_v12 = vpop.permute.xlu0 %410 }
 0x206   : > { %v393_v8 = vpop.permute.xlu1 %392 }
 0x207   : > { %v394_v9 = vsel %vm241_vm0, %v391_v6, %v393_v8  ;;  %v436_v10 = vsel %vm296_vm3, %v384_v60, %v393_v8 }
 0x208   : > { %478 = vmatprep.subr.bf16.mxu1 %v436_v10  ;;  %v432_v11 = vsel %vm296_vm3, %v383_v59, %v394_v9 }
 0x209   : > { %479 = vmatpush1.bf16.msra.mxu1 %v432_v11  ;;  %v421_v22 = vpop.permute.xlu0 %420 }
 0x20a   : > { %v403_v13 = vpop.permute.xlu1 %402 }
 0x20b   : > { %v404_v15 = vsel %vm257_vm4, %v401_v7, %v403_v13  ;;  %v444_v16 = vsel %vm296_vm3, %v398_v1, %v403_v13 }
 0x20c   : > { %480 = vmatprep.subr.bf16.mxu1 %v444_v16  ;;  %v440_v17 = vsel %vm296_vm3, %v399_v14, %v404_v15 }
 0x20d   : > { %481 = vmatpush1.bf16.msra.mxu1 %v440_v17  ;;  %v426_v29 = vpop.permute.xlu0 %425 }
 0x20e   : > { %v413_v18 = vpop.permute.xlu1 %412 }
 0x20f   : > { %v414_v20 = vsel %vm269_vm6, %v411_v12, %v413_v18  ;;  %v452_v21 = vsel %vm296_vm3, %v408_v3, %v413_v18 }
 0x210   : > { %482 = vmatprep.subr.bf16.mxu1 %v452_v21  ;;  %v448_v23 = vsel %vm296_vm3, %v409_v19, %v414_v20 }
 0x211   : > { %483 = vmatpush1.bf16.msra.mxu1 %v448_v23 }
 0x212   : > { %v423_v24 = vpop.permute.xlu1 %422 }
 0x213   : > { %v424_v26 = vsel %vm281_vm9, %v421_v22, %v423_v24  ;;  %v460_v27 = vsel %vm296_vm3, %v418_v5, %v423_v24 }
 0x214   : > { %484 = vmatprep.subr.bf16.mxu1 %v460_v27  ;;  %v456_v28 = vsel %vm296_vm3, %v419_v25, %v424_v26 }
 0x215   : > { %485 = vmatpush1.bf16.msra.mxu1 %v456_v28 }
 0x216   : > { %v428_v30 = vpop.permute.xlu1 %427 }
 0x217   : > { %v429_v31 = vsel %vm287_vm10, %v426_v29, %v428_v30  ;;  %590 = vmatprep.subr.msk.bf16.mxu1 %vm296_vm3, %v428_v30 }
 0x218   : > { %v473_v32 = vsel %vm296_vm3, %v429_v31, 0 }
 0x219   : > { %487 = vmatpush1.bf16.msra.mxu1 %v473_v32 }
 0x21c   : > { %591 = vmatmul.mubr.msk.bf16.vlgmr.msra.gmra.mrb[0].mxu1 %vm468_vm12, %v462_v33 }
 0x21e   : > { %v466_v34 = vpop.permute.xlu0 %465 }
 0x2ef   : > { %v512_v35 = vpop.f32.mrb[0].mxu1 }
 0x2f0   : > { %v513_v36 = vadd.f32 %v512_v35, %v466_v34  ;;  %v514_v37 = vpop.f32.mrb[1].mxu1 }
 0x2f1   : > { %v515_v38 = vadd.f32 %v514_v37, %v466_v34  ;;  %v516_v39 = vpop.f32.mrb[2].mxu1 }
 0x2f2   : > { %v519_v40 = vmax.f32 %v513_v36, 0.0  ;;  %v517_v41 = vpop.f32.mrb[3].mxu1 }
 0x2f3   : > { %v520_v42 = vmax.f32 %v515_v38, 0.0 }
 0x2f4   : > { %521 = vst [vmem:[%s224_s20] sm:$0xff] %v519_v40 }
 0x2f5   : > { %523 = vst.msk [vmem:[%s224_s20 + $0x8] sm:$0xff] %vm522_vm13, %v520_v42 }
 0x2f6 PF: > { %s15_s18 = sadd.s32 1, %s621_s18  }
 0x2f7   : > { %p12_p4 = scmp.ge.s32.totalorder %s15_s18, 4  }
 0x2f9   :  { %14 = sbr.rel (!%p12_p4) target bundleno = 1 (0x1), region = 70 }

</bundles_post_ra>
